<compile_context>
chip_gen: v6e
topology: v6e:2x2x1
jax: 0.10.0
libtpu: 0.0.40
codegen_flags: <defaults>
</compile_context>

<pallas_src>
import jax
import jax.numpy as jnp
from jax.experimental import pallas as pl
from jax.experimental.pallas import tpu as pltpu


def _readout_sigmoid_kernel(x_ref, w_ref, b_ref, o_ref):
    """sigmoid(w @ x^T + b) for one row tile.

    x_ref: (TILE_M, d)   activations (input dtype)
    w_ref: (1, d)        Linear weight (same dtype as x), VMEM-resident
    b_ref: (1,)          Linear bias, f32 scalar in SMEM
    o_ref: (1, TILE_M)   f32, lane-dense output block
    """
    x = x_ref[...]                      # (TILE_M, d)
    w = w_ref[...]                      # (1, d)
    b = b_ref[0]                        # f32 scalar from SMEM
    # w(1,d) contracted with x(TILE_M,d) on d -> (1, TILE_M): lane-dense output,
    # f32 accumulation on the MXU.  This is a transposed-RHS matmul which the
    # MXU weight-load path handles directly (no XLU vxpose of the big x tile);
    # verify with pl.lower_as_mlir if lowering ever changes.
    logits = jax.lax.dot_general(
        w, x,
        dimension_numbers=(((1,), (1,)), ((), ())),
        preferred_element_type=jnp.float32,
    )                                   # (1, TILE_M) f32
    o_ref[...] = jax.nn.sigmoid(logits + b)


def _round_up(x, m):
    return ((x + m - 1) // m) * m


def _vmem_limit_bytes():
    """Generation-aware scoped-VMEM limit: ~75% of physical, capped at 64 MiB.

    v5e/v6e (128 MiB physical) -> 64 MiB; v7x (64 MiB physical) -> 48 MiB.
    Falls back to a conservative 48 MiB if the query is unavailable.
    """
    try:
        phys = int(pltpu.get_tpu_info().vmem_capacity_bytes)
        return int(min(phys * 3 // 4, 64 * 1024 * 1024))
    except Exception:
        return 48 * 1024 * 1024


def _choose_tile_m(m, d, itemsize, vmem_limit):
    """Row tile sized by *bytes* against the real VMEM footprint.

    Footprint per tile row (double-buffered pipeline):
      2 input rows of round_up(d,128)*itemsize bytes  (lane-padded width)
      + 2 output buffers of (8, tile_m) f32 -> 64 bytes/row (sublane padding)
    plus the resident (sublane-padded, double-buffered) weight and headroom.
    """
    d_pad = _round_up(max(d, 1), 128)                 # lane-padded width in VMEM
    weight_bytes = 2 * 8 * d_pad * itemsize           # tiny, resident
    headroom = 2 * 1024 * 1024                        # compiler-internal scratch
    budget = max(vmem_limit - weight_bytes - headroom, 1 * 1024 * 1024)
    per_row = 2 * d_pad * itemsize + 64
    rows = max(128, (budget // per_row) // 128 * 128)
    # Guarantee >= 2 grid steps once the input exceeds a few MiB so the
    # "parallel" grid axis can shard across both v7x TensorCores.
    if m * d_pad * itemsize > 4 * 1024 * 1024:
        rows = min(rows, _round_up((m + 1) // 2, 128))
    # Never pick a tile (much) bigger than the problem.
    rows = min(rows, _round_up(m, 128))
    return int(max(128, rows))


@jax.jit
def mlp_forward(latent_features, target, weight, bias):
    """JAX/Pallas equivalent of MLP.forward.

    latent_features: (B, L, d)
    target:          (B, L)   any numeric dtype
    weight:          (1, d)   (nn.Linear(d, 1).weight)
    bias:            (1,)     (nn.Linear(d, 1).bias)

    Returns ([pred (B, L) f32], [target.astype(f32)]).
    """
    B, L, d = latent_features.shape
    M = B * L
    x_dtype = latent_features.dtype
    itemsize = jnp.dtype(x_dtype).itemsize

    x2d = latent_features.reshape(M, d)           # streamed in original dtype
    # NOTE: if activations are bf16 the f32 weight is downcast here; the
    # accumulation is still f32 so the deviation from PyTorch is tiny.
    w2d = weight.reshape(1, d).astype(x_dtype)
    b1 = bias.reshape(1).astype(jnp.float32)      # scalar for SMEM

    vmem_limit = _vmem_limit_bytes()
    tile_m = _choose_tile_m(M, d, itemsize, vmem_limit)
    num_tiles = int(pl.cdiv(M, tile_m))
    # Prefer an even step count (keeps both v7x cores busy every pair of steps).
    if num_tiles > 2 and num_tiles % 2 == 1:
        tile_m2 = max(128, _round_up(int(pl.cdiv(M, num_tiles + 1)), 128))
        tile_m = min(tile_m, tile_m2)
        num_tiles = int(pl.cdiv(M, tile_m))

    cost = pl.CostEstimate(
        flops=2 * M * d,
        transcendentals=M,
        bytes_accessed=M * d * itemsize + 4 * M + d * itemsize,
    )

    out = pl.pallas_call(
        _readout_sigmoid_kernel,
        out_shape=jax.ShapeDtypeStruct((1, M), jnp.float32),
        grid=(num_tiles,),
        in_specs=[
            pl.BlockSpec((tile_m, d), lambda i: (i, 0)),          # activations
            pl.BlockSpec((1, d), lambda i: (0, 0)),               # weight (resident)
            pl.BlockSpec(memory_space=pltpu.MemorySpace.SMEM),    # bias scalar
        ],
        out_specs=pl.BlockSpec((1, tile_m), lambda i: (0, i)),
        compiler_params=pltpu.CompilerParams(
            dimension_semantics=("parallel",),
            vmem_limit_bytes=vmem_limit,
        ),
        cost_estimate=cost,
    )(x2d, w2d, b1)

    pred = out[0].reshape(B, L)       # == cat(chunks, dim=1).squeeze(2).float()
    targ = target.astype(jnp.float32)
    return [pred], [targ]


if __name__ == "__main__":
    # Small deterministic example shapes consistent with the forward pass.
    B, L, d = 2, 4, 32   # batch, num labels (chunks along dim 1), feature_d

    key = jax.random.PRNGKey(0)
    k_x, k_t, k_w, k_b = jax.random.split(key, 4)

    latent_features = jax.random.normal(k_x, (B, L, d), dtype=jnp.float32)
    target = jax.random.bernoulli(k_t, 0.5, (B, L)).astype(jnp.int32)

    # Deterministic nn.Linear(d, 1)-style init: U(-1/sqrt(d), 1/sqrt(d)).
    bound = 1.0 / jnp.sqrt(jnp.float32(d))
    weight = jax.random.uniform(k_w, (1, d), jnp.float32, -bound, bound)
    bias = jax.random.uniform(k_b, (1,), jnp.float32, -bound, bound)

    pred_list, targ_list = mlp_forward(latent_features, target, weight, bias)
    jax.block_until_ready(pred_list[0])
    jax.block_until_ready(targ_list[0])

    # Sanity check against a plain-JAX reference.
    ref = jax.nn.sigmoid(
        jnp.einsum("bld,od->blo", latent_features, weight) + bias
    )[..., 0]
    assert pred_list[0].shape == (B, L)
    assert targ_list[0].dtype == jnp.float32
    assert jnp.allclose(pred_list[0], ref, atol=1e-5), "mismatch vs reference"

    print("KERNEL_OK")
</pallas_src>

<mosaic_0001>
module attributes {stable_mosaic.version = 11 : i64} {
  func.func @_readout_sigmoid_kernel(%arg0: i32, %arg1: memref<128x32xf32, #tpu.memory_space<vmem>>, %arg2: memref<1x32xf32, #tpu.memory_space<vmem>>, %arg3: memref<1xf32, #tpu.memory_space<smem>>, %arg4: memref<1x128xf32, #tpu.memory_space<vmem>>) attributes {dimension_semantics = [#tpu.dimension_semantics<parallel>], iteration_bounds = array<i64: 1>, scalar_prefetch = 0 : i64, scratch_operands = 0 : i64, tpu.core_type = #tpu.core_type<tc>, window_params = [{transform_indices = @transform_0, window_bounds = array<i64: 128, 32>}, {pipeline_mode = #tpu.pipeline_mode<synchronous>, transform_indices = @transform_1, window_bounds = array<i64: 1, 32>}, {transform_indices = @transform_2, window_bounds = array<i64: 1>}, {transform_indices = @transform_3, window_bounds = array<i64: 1, 128>}]} {
    %c0 = arith.constant 0 : index
    %c0_0 = arith.constant 0 : index
    %0 = vector.load %arg1[%c0, %c0_0] : memref<128x32xf32, #tpu.memory_space<vmem>>, vector<128x32xf32>
    %c0_1 = arith.constant 0 : index
    %c0_2 = arith.constant 0 : index
    %1 = vector.load %arg2[%c0_1, %c0_2] : memref<1x32xf32, #tpu.memory_space<vmem>>, vector<1x32xf32>
    %c0_3 = arith.constant 0 : index
    %2 = memref.load %arg3[%c0_3] : memref<1xf32, #tpu.memory_space<smem>>
    %cst = arith.constant dense<0.000000e+00> : vector<1x128xf32>
    %3 = tpu.matmul %1, %0, %cst {dimension_numbers = #tpu.dot_dimension_numbers<[1], [1], [0], [0], [0, 0, 1, 0], [], []>} : vector<1x32xf32>, vector<128x32xf32>, vector<1x128xf32> -> vector<1x128xf32>
    %4 = vector.broadcast %2 : f32 to vector<1x128xf32>
    %5 = arith.addf %3, %4 : vector<1x128xf32>
    %6 = arith.negf %5 : vector<1x128xf32>
    %7 = math.exp %6 : vector<1x128xf32>
    %cst_4 = arith.constant 1.000000e+00 : f32
    %8 = vector.broadcast %cst_4 : f32 to vector<1x128xf32>
    %9 = arith.addf %8, %7 : vector<1x128xf32>
    %10 = arith.divf %8, %9 : vector<1x128xf32>
    %c0_5 = arith.constant 0 : index
    %c0_6 = arith.constant 0 : index
    %11 = vector.load %arg4[%c0_5, %c0_6] : memref<1x128xf32, #tpu.memory_space<vmem>>, vector<1x128xf32>
    tpu.vector_store %arg4[%c0_5, %c0_6], %10 {strides = array<i32>} : memref<1x128xf32, #tpu.memory_space<vmem>>, vector<1x128xf32>,
    return
  }
  func.func @transform_0(%arg0: i32) -> (i32, i32) {
    %c0_i32 = arith.constant 0 : i32
    %c0_i32_0 = arith.constant 0 : i32
    return %arg0, %c0_i32 : i32, i32
  }
  func.func @transform_1(%arg0: i32) -> (i32, i32) {
    %c0_i32 = arith.constant 0 : i32
    %c0_i32_0 = arith.constant 0 : i32
    %c0_i32_1 = arith.constant 0 : i32
    return %c0_i32, %c0_i32_0 : i32, i32
  }
  func.func @transform_2(%arg0: i32) -> i32 {
    %c0_i32 = arith.constant 0 : i32
    %c0_i32_0 = arith.constant 0 : i32
    return %c0_i32 : i32
  }
  func.func @transform_3(%arg0: i32) -> (i32, i32) {
    %c0_i32 = arith.constant 0 : i32
    %c0_i32_0 = arith.constant 0 : i32
    return %c0_i32, %arg0 : i32, i32
  }
}

</mosaic_0001>

<bundles_post_ra>
// kernel: squeeze.1
= control target key start
LH: loop header
LB: loop body
LE: loop exit
PB: predicated region body
PF: predicated region fallthrough
CT: control target
= control target key end

     0   :  { %s77_s0 = inlined_call_operand.vmem [shape: f32[8], index: 0, kind: input, shape index: {}]   ;;  %s78_s1 = inlined_call_operand.hbm [shape: f32[2,4], index: 1, kind: output, shape index: {}]  }
   0x1   :  { %v6_v0 = vld [vmem:[%s77_s0] sm:$0x1] }
   0x2   :  { %2 = vsyncpa [#allocation1], 0  ;;  %7 = vst [vmem:[#allocation3] sm:$0x1] %v6_v0  ;;  %vm9_vm0 = vcmask 31744   ;;  %s59_s0 = smov 124  }
   0x3   :  { %s60_s8 = smov [#allocation0]  }
   0x4   :  { %s29_s9 = sshll.u32 %s60_s8, 4  ;;  %s30_s9 = int_to_ptr.vmem [resolvable:$true] %s29_s9 }
   0x5   :  { %s37_s10 = scalar_lea.vmem %s30_s9, 32  ;;  %p42_p1 = scmp.lt.s32.totalorder %s30_s9, %s30_s9 }
   0x6   :  { %p38_p0 = scmp.ne.s32.totalorder %s30_s9, %s37_s10  ;;  %p43_p2 = scmp.lt.s32.totalorder %s37_s10, %s37_s10 }
   0x8   :  { %p44_p3 = por %p43_p2, %p42_p1 }
   0x9   :  { %v11_v1 = vld [vmem:[#allocation3] sm:$0x1]  }
   0xa   :  { %v8_v2 = vld [vmem:[#allocation3] sm:$0x1]   ;;  %12 = vrot.lane.b32.xlu0 %v11_v1, %s59_s0  ;;  %p45_p4 = pnand %p44_p3, %p38_p0 }
   0xb   :  { %10 = vst.msk [vmem:[#allocation2] sm:$0x1] %vm9_vm0, %v8_v2  }
  0x7c   :  { %v13_v3 = vpop.permute.xlu0 %12  }
  0x7d   :  { %16 = vst.msk [vmem:[#allocation2 + $0x1] sm:$0x1] %vm9_vm0, %v13_v3  }
  0x84   :  { %v21_v4 = vld [vmem:[#allocation2] sm:$0x3] }
  0x85   :  { %24 = vst [vmem:[#allocation0] sm:$0x3] %v21_v4 }
  0x86   :  { %48 = shalt.err (!%p45_p4)
}
  0x87   :  { %32 = dma.vmem_to_hbm [thread:$0]  %s30_s9, 32, %s78_s1, [#allocation1]  }
  0x88   :  { %57 = dma.done.wait [#allocation1], 32  }
  0x89   :  { %58 = vsyncadd [#allocation1], 4294967264 }
  0x8a   :  { %34 = vsyncpa [#allocation1], 1 }

// kernel: mlp_forward.1
= control target key start
LH: loop header
LB: loop body
LE: loop exit
PB: predicated region body
PF: predicated region fallthrough
CT: control target
= control target key end

     0   :  { %9 = vsyncpa [#allocation4], 0  ;;  %s337_s0 = inlined_call_operand.hbm [shape: f32[8,32], index: 0, kind: input, shape index: {}]   ;;  %s338_s1 = inlined_call_operand.vmem [shape: f32[1,32], index: 1, kind: input, shape index: {}]   ;;  %s339_s2 = inlined_call_operand.<no memory space> [shape: f32[1], index: 2, kind: input, shape index: {}]   ;;  %s340_s3 = inlined_call_operand.vmem [shape: f32[1,8], index: 3, kind: output, shape index: {}]  }
   0x1   :  { %14 = vsyncadd [#allocation4], 1920  ;;  %s283_s12 = smov [#allocation3]  }
   0x2   :  { %s15_s13 = sshll.u32 %s283_s12, 4  ;;  %s16_s13 = int_to_ptr.vmem [resolvable:$true] %s15_s13 }
   0x3   :  { %s269_s14 = scalar_lea.vmem %s16_s13, 128  ;;  %s273_s15 = scalar_lea.vmem %s16_s13, 2048 }
   0x4   :  { %p270_p0 = scmp.ne.s32.totalorder %s16_s13, %s269_s14  ;;  %p274_p1 = scmp.lt.s32.totalorder %s16_s13, %s16_s13 }
   0x5   :  { %p275_p2 = scmp.lt.s32.totalorder %s273_s15, %s269_s14 }
   0x7   :  { %p276_p3 = por %p275_p2, %p274_p1 }
   0x9   :  { %p277_p4 = pnand %p276_p3, %p270_p0 }
   0xb   :  { %280 = shalt.err (!%p277_p4)
}
   0xc   :  { %s284_s16 = smov 128   ;;  %s285_s17 = smov 8  }
   0xd   :  { %21 = dma.hbm_to_vmem [thread:$0]  %s337_s0, 128, %s16_s13, [#allocation4], %s284_s16, %s284_s16, %s285_s17  }
   0xe   :  { %281 = dma.done.wait [#allocation4], 2048  }
   0xf   :  { %282 = vsyncadd [#allocation4], 4294965248  ;;  %v286_v0 = vmov 0.0   ;;  %vm287_vm0 = vmmov 0   ;;  %vm48_vm1 = vcmask 261120   ;;  %v44_v1 = vld [vmem:[#allocation3 + $0x78] sm:$0xff]  ;;  %v47_v18 = vstv %s339_s2 }
  0x10   :  { %217 = vmatprep.subr.mxu0 %v286_v0  ;;  %249 = vmatprep.mubr.msk.f32.mxu0 %vm287_vm0, %v286_v0  ;;  %v43_v2 = vld [vmem:[#allocation3 + $0x70] sm:$0xff]  ;;  %v42_v3 = vld [vmem:[#allocation3 + $0x68] sm:$0xff]  ;;  %v41_v4 = vld [vmem:[#allocation3 + $0x60] sm:$0xff] }
  0x11   :  { %218 = vmatpush3.xpose.msk.msra.mxu0 %vm48_vm1, %v44_v1  ;;  %v40_v5 = vld [vmem:[#allocation3 + $0x58] sm:$0xff]  ;;  %v39_v6 = vld [vmem:[#allocation3 + $0x50] sm:$0xff]  ;;  %v38_v7 = vld [vmem:[#allocation3 + $0x48] sm:$0xff] }
  0x12   :  { %219 = vmatprep.subr.mxu0 %v286_v0  ;;  %v37_v8 = vld [vmem:[#allocation3 + $0x40] sm:$0xff]  ;;  %v36_v9 = vld [vmem:[#allocation3 + $0x38] sm:$0xff]  ;;  %v35_v10 = vld [vmem:[#allocation3 + $0x30] sm:$0xff] }
  0x13   :  { %v34_v11 = vld [vmem:[#allocation3 + $0x28] sm:$0xff]  ;;  %v33_v12 = vld [vmem:[#allocation3 + $0x20] sm:$0xff]  ;;  %v32_v13 = vld [vmem:[#allocation3 + $0x18] sm:$0xff] }
  0x14   :  { %v31_v14 = vld [vmem:[#allocation3 + $0x10] sm:$0xff]  ;;  %v30_v15 = vld [vmem:[#allocation3 + $0x8] sm:$0xff]  ;;  %v29_v16 = vld [vmem:[#allocation3] sm:$0xff] }
  0x15   :  { %220 = vmatpush3.xpose.msk.msra.mxu0 %vm48_vm1, %v43_v2  ;;  %v45_v17 = vld [vmem:[%s338_s1] sm:$0x1] }
  0x16   :  { %221 = vmatprep.subr.mxu0 %v286_v0 }
  0x19   :  { %222 = vmatpush3.xpose.msk.msra.mxu0 %vm48_vm1, %v42_v3 }
  0x1a   :  { %223 = vmatprep.subr.mxu0 %v286_v0 }
  0x1d   :  { %224 = vmatpush3.xpose.msk.msra.mxu0 %vm48_vm1, %v41_v4 }
  0x1e   :  { %225 = vmatprep.subr.mxu0 %v286_v0 }
  0x21   :  { %226 = vmatpush3.xpose.msk.msra.mxu0 %vm48_vm1, %v40_v5 }
  0x22   :  { %227 = vmatprep.subr.mxu0 %v286_v0 }
  0x25   :  { %228 = vmatpush3.xpose.msk.msra.mxu0 %vm48_vm1, %v39_v6 }
  0x26   :  { %229 = vmatprep.subr.mxu0 %v286_v0 }
  0x29   :  { %230 = vmatpush3.xpose.msk.msra.mxu0 %vm48_vm1, %v38_v7 }
  0x2a   :  { %231 = vmatprep.subr.mxu0 %v286_v0 }
  0x2d   :  { %232 = vmatpush3.xpose.msk.msra.mxu0 %vm48_vm1, %v37_v8 }
  0x2e   :  { %233 = vmatprep.subr.mxu0 %v286_v0 }
  0x31   :  { %234 = vmatpush3.xpose.msk.msra.mxu0 %vm48_vm1, %v36_v9 }
  0x32   :  { %235 = vmatprep.subr.mxu0 %v286_v0 }
  0x35   :  { %236 = vmatpush3.xpose.msk.msra.mxu0 %vm48_vm1, %v35_v10 }
  0x36   :  { %237 = vmatprep.subr.mxu0 %v286_v0 }
  0x39   :  { %238 = vmatpush3.xpose.msk.msra.mxu0 %vm48_vm1, %v34_v11 }
  0x3a   :  { %239 = vmatprep.subr.mxu0 %v286_v0 }
  0x3d   :  { %240 = vmatpush3.xpose.msk.msra.mxu0 %vm48_vm1, %v33_v12 }
  0x3e   :  { %241 = vmatprep.subr.mxu0 %v286_v0 }
  0x41   :  { %242 = vmatpush3.xpose.msk.msra.mxu0 %vm48_vm1, %v32_v13 }
  0x42   :  { %243 = vmatprep.subr.mxu0 %v286_v0 }
  0x45   :  { %244 = vmatpush3.xpose.msk.msra.mxu0 %vm48_vm1, %v31_v14 }
  0x46   :  { %245 = vmatprep.subr.mxu0 %v286_v0 }
  0x49   :  { %246 = vmatpush3.xpose.msk.msra.mxu0 %vm48_vm1, %v30_v15 }
  0x4a   :  { %247 = vmatprep.subr.mxu0 %v286_v0 }
  0x4d   :  { %248 = vmatpush3.xpose.msk.msra.mxu0 %vm48_vm1, %v29_v16 }
  0x50   :  { %250 = vmatmul.mubr.msk.f32.vlgmr.msra.gmra.mxu0 %vm48_vm1, %v45_v17 }
 0x110   :  { %v166_v19 = vpop.f32.mrf.mxu0 }
 0x111   :  { %v167_v20 = vadd.f32 %v166_v19, %v47_v18 }
 0x112   :  { %v251_v21 = vpop.f32.mrf.mxu0 }
 0x113   :  { %v199_v22 = vmul.f32 -1.442695, %v167_v20 }
 0x115   :  { %257 = vpow2.f32 %v199_v22 }
 0x122   :  { %v258_v23 = vpop.eup %257 }
 0x123   :  { %v173_v24 = vadd.f32 1.0, %v258_v23 }
 0x125   :  { %259 = vrcp.f32 %v173_v24 }
 0x132   :  { %v260_v25 = vpop.eup %259 }
 0x133   :  { %176 = vst [vmem:[%s340_s3] sm:$0x1] %v260_v25 }
 0x134   :  { %181 = vsyncpa [#allocation4], 1 }

</bundles_post_ra>
